<compile_context>
chip_gen: v6e
topology: v6e:2x2x1
jax: 0.10.0
libtpu: 0.0.40
codegen_flags: <defaults>
</compile_context>

<pallas_src>
import math

import jax
import jax.numpy as jnp
from jax import lax
from jax.experimental import pallas as pl
from jax.experimental.pallas import tpu as pltpu

LANE = 128


def _round_up(n, m):
    return (n + m - 1) // m * m


# ---------------------------------------------------------------------------
# Per-generation sizing (VMEM limit, row tile, target column tile)
# ---------------------------------------------------------------------------
def _chip_defaults():
    vmem_bytes = None
    try:
        vmem_bytes = int(pltpu.get_tpu_info().vmem_capacity_bytes)
    except Exception:
        pass
    if not vmem_bytes:
        vmem_bytes = 64 * 1024 * 1024            # v7x-safe fallback
    vmem_limit = int(vmem_bytes * 0.8)           # headroom for compiler scratch

    tile_n = 256                                 # v6e/v7x: 256-wide MXU
    try:
        kind = jax.devices()[0].device_kind.lower()
        if any(t in kind for t in ("v2", "v3", "v4", "v5")):
            tile_n = 128                         # 128x128-MXU generations
    except Exception:
        pass

    # Streamed VMEM per step ~ 2 buffers x 3 streams x TILE_N x TILE_K x 2 B.
    stream_budget = int(vmem_limit * 0.4)
    tile_k_target = stream_budget // (12 * tile_n)
    tile_k_target = max(tile_n, min(8192, (tile_k_target // LANE) * LANE))
    return tile_n, tile_k_target, vmem_limit


def make_config(n_nodes):
    tile_n, tile_k_target, vmem_limit = _chip_defaults()
    n_pad = _round_up(n_nodes, tile_n)
    blocks = n_pad // tile_n
    # Largest K tile that is a multiple of TILE_N, divides n_pad, fits budget.
    best = 1
    for d in range(1, blocks + 1):
        if blocks % d == 0 and d * tile_n <= tile_k_target:
            best = d
    tile_k = best * tile_n
    return {"n": n_nodes, "n_pad": n_pad, "tile_n": tile_n, "tile_k": tile_k,
            "vmem_limit": vmem_limit}


# ---------------------------------------------------------------------------
# Graph-static prep: cast/pad ONCE, reuse across forward calls
# ---------------------------------------------------------------------------
def prepare_graph(mx, adj, cfg):
    n, n_pad = cfg["n"], cfg["n_pad"]
    bf16 = jnp.bfloat16
    mx_b = jnp.zeros((n_pad, n_pad), bf16).at[:n, :n].set(mx.astype(bf16))
    adj_b = jnp.zeros((n_pad, n_pad), bf16).at[:n, :n].set(adj.astype(bf16))
    return {"mx": mx_b, "adj": adj_b}


# ---------------------------------------------------------------------------
# Kernel 1: fused projection  sup = x @ [W_out | W_in | W_self]  -> (N, 64)
# ---------------------------------------------------------------------------
def _proj_kernel(x_ref, w_ref, sup_ref):
    sup_ref[...] = jnp.dot(
        x_ref[...], w_ref[...], preferred_element_type=jnp.float32
    ).astype(sup_ref.dtype)


def _project(x_b, w_cat_b, cfg):
    n_pad, nfeat = x_b.shape
    width = w_cat_b.shape[1]                     # 64
    tn = cfg["tile_n"]
    return pl.pallas_call(
        _proj_kernel,
        out_shape=jax.ShapeDtypeStruct((n_pad, width), jnp.bfloat16),
        grid_spec=pltpu.PrefetchScalarGridSpec(
            num_scalar_prefetch=0,
            grid=(n_pad // tn,),
            in_specs=[
                pl.BlockSpec((tn, nfeat), lambda i: (i, 0)),
                pl.BlockSpec((nfeat, width), lambda i: (0, 0)),
            ],
            out_specs=pl.BlockSpec((tn, width), lambda i: (i, 0)),
        ),
        compiler_params=pltpu.CompilerParams(
            dimension_semantics=("parallel",),
            vmem_limit_bytes=cfg["vmem_limit"],
        ),
    )(x_b, w_cat_b)


# ---------------------------------------------------------------------------
# Kernel 2: (row, K)-tiled graph aggregation + folded dense tail
# ---------------------------------------------------------------------------
def _adj_kernel(mx_ik_ref, mx_ki_ref, adj_ref, sup_ref,
                b3_ref, m_ref, bfold_ref, out_ref,
                acc_out, acc_in, acc_self):
    k = pl.program_id(1)

    @pl.when(k == 0)
    def _():
        acc_out[...] = jnp.zeros_like(acc_out)
        acc_in[...] = jnp.zeros_like(acc_in)
        acc_self[...] = jnp.zeros_like(acc_self)

    sup = sup_ref[...]                                          # (TILE_K, 64) bf16
    acc_out[...] += jnp.dot(mx_ik_ref[...], sup,
                            preferred_element_type=jnp.float32)
    # mx.T @ sup: contract the (TILE_K, TILE_N) column block of mx over dim 0;
    # no transposed copy of mx ever exists in HBM.
    acc_in[...] += lax.dot_general(
        mx_ki_ref[...], sup, (((0,), (0,)), ((), ())),
        preferred_element_type=jnp.float32)
    acc_self[...] += jnp.dot(adj_ref[...], sup,
                             preferred_element_type=jnp.float32)

    @pl.when(k == pl.num_programs(1) - 1)
    def _():
        # Biases are 64-wide bands (zeros outside each branch's columns); the
        # out-of-band garbage columns are annihilated by zero rows of m_ref.
        f_out = jnp.maximum(acc_out[...] + b3_ref[0:1, :], 0.0)
        f_in = jnp.maximum(acc_in[...] + b3_ref[1:2, :], 0.0)
        f_self = jnp.maximum(acc_self[...] + b3_ref[2:3, :], 0.0)
        prec = lax.Precision.HIGHEST      # explicit precision for the small tail
        # The module fixes the concat width at 64, so the 64/128/192 row splits
        # of the stacked tail matrix are static.
        out_ref[...] = (
            jnp.dot(f_out, m_ref[0:64, :],
                    preferred_element_type=jnp.float32, precision=prec)
            + jnp.dot(f_in, m_ref[64:128, :],
                      preferred_element_type=jnp.float32, precision=prec)
            + jnp.dot(f_self, m_ref[128:192, :],
                      preferred_element_type=jnp.float32, precision=prec)
            + bfold_ref[...]
        ).astype(out_ref.dtype)


def adjtrigcn_apply(x, graph, params, cfg):
    """Eval-mode forward using pre-prepared (cached) graph operands."""
    n, n_pad = cfg["n"], cfg["n_pad"]
    tn, tk = cfg["tile_n"], cfg["tile_k"]
    nfeat = x.shape[1]
    ph = params["w_out"].shape[1]
    c_self = params["w_self"].shape[1]
    width = 2 * ph + c_self
    assert width == 64, "layer1 expects a 64-wide concat (proportion must be even)"
    nout = params["layer3"].shape[1]
    nout_pad = _round_up(nout, LANE)
    f32, bf16 = jnp.float32, jnp.bfloat16

    # Per-call (cheap) prep: pad/cast x, fused projection -> one 64-wide sup.
    x_b = jnp.zeros((n_pad, nfeat), bf16).at[:n].set(x.astype(bf16))
    w_cat = jnp.concatenate(
        [params["w_out"], params["w_in"], params["w_self"]], axis=1).astype(bf16)
    sup = _project(x_b, w_cat, cfg)                              # (n_pad, 64) bf16

    # Fold the activation-free dense tail: L1 @ L2 @ L3 and its bias.
    l2l3 = params["layer2"] @ params["layer3"]
    m_all = (params["layer1"] @ l2l3).astype(f32)                # (64, nout)
    b_fold = (params["bias1"] @ l2l3 + params["bias2"] @ params["layer3"]
              + params["bias3"]).astype(f32)

    # Merged residents: (3, 64) bias bands, (192, nout_pad) banded tail stack.
    b3 = jnp.zeros((3, width), f32)
    b3 = b3.at[0, :ph].set(params["b_out"].astype(f32))
    b3 = b3.at[1, ph:2 * ph].set(params["b_in"].astype(f32))
    b3 = b3.at[2, 2 * ph:].set(params["b_self"].astype(f32))

    m_stack = jnp.zeros((3 * width, nout_pad), f32)
    m_stack = m_stack.at[0:ph, :nout].set(m_all[:ph])
    m_stack = m_stack.at[width + ph:width + 2 * ph, :nout].set(m_all[ph:2 * ph])
    m_stack = m_stack.at[2 * width + 2 * ph:3 * width, :nout].set(m_all[2 * ph:])

    b_fold_p = jnp.zeros((1, nout_pad), f32).at[0, :nout].set(b_fold)

    out = pl.pallas_call(
        _adj_kernel,
        out_shape=jax.ShapeDtypeStruct((n_pad, nout_pad), f32),
        grid_spec=pltpu.PrefetchScalarGridSpec(
            num_scalar_prefetch=0,
            grid=(n_pad // tn, n_pad // tk),
            in_specs=[
                pl.BlockSpec((tn, tk), lambda i, k: (i, k)),       # mx row block
                pl.BlockSpec((tk, tn), lambda i, k: (k, i)),       # mx col block
                pl.BlockSpec((tn, tk), lambda i, k: (i, k)),       # adj row block
                pl.BlockSpec((tk, width), lambda i, k: (k, 0)),    # sup K block
                pl.BlockSpec((3, width), lambda i, k: (0, 0)),     # bias bands
                pl.BlockSpec((3 * width, nout_pad), lambda i, k: (0, 0)),
                pl.BlockSpec((1, nout_pad), lambda i, k: (0, 0)),
            ],
            out_specs=pl.BlockSpec((tn, nout_pad), lambda i, k: (i, 0)),
            scratch_shapes=[
                pltpu.VMEM((tn, width), f32),
                pltpu.VMEM((tn, width), f32),
                pltpu.VMEM((tn, width), f32),
            ],
        ),
        compiler_params=pltpu.CompilerParams(
            dimension_semantics=("parallel", "arbitrary"),
            vmem_limit_bytes=cfg["vmem_limit"],
        ),
    )(graph["mx"], graph["mx"], graph["adj"], sup, b3, m_stack, b_fold_p)

    return out[:n, :nout]


def adjtrigcn_forward(x, mx, adj, params):
    """Convenience wrapper (single call).  For repeated forwards, call
    make_config / prepare_graph once and reuse with adjtrigcn_apply."""
    cfg = make_config(x.shape[0])
    graph = prepare_graph(mx, adj, cfg)
    return adjtrigcn_apply(x, graph, params, cfg)


# ---------------------------------------------------------------------------
# Parameter init (matches the PyTorch reset_parameters rules) and reference
# ---------------------------------------------------------------------------
def init_params(key, nfeat, nout, proportion):
    ph = int(proportion / 2)
    c0 = 64 - proportion

    def uni(k, shape, fan_out):
        stdv = 1.0 / math.sqrt(fan_out)
        return jax.random.uniform(k, shape, jnp.float32, -stdv, stdv)

    ks = jax.random.split(key, 12)
    return {
        "w_out":  uni(ks[0], (nfeat, ph), ph),
        "b_out":  uni(ks[1], (ph,), ph),
        "w_in":   uni(ks[2], (nfeat, ph), ph),
        "b_in":   uni(ks[3], (ph,), ph),
        "w_self": uni(ks[4], (nfeat, c0), c0),
        "b_self": uni(ks[5], (c0,), c0),
        "layer1": uni(ks[6], (64, 32), 32),
        "bias1":  uni(ks[7], (32,), 32),
        "layer2": uni(ks[8], (32, 16), 16),
        "bias2":  uni(ks[9], (16,), 16),
        "layer3": uni(ks[10], (16, nout), nout),
        "bias3":  uni(ks[11], (nout,), nout),
    }


def adjtrigcn_reference(x, mx, adj, params):
    """Pure-JAX reference (eval mode, dropout = identity).  Inputs and the sup
    projections are rounded to bf16 to mirror the kernel's storage precision;
    all arithmetic stays f32 and the dense tail is NOT folded, so this also
    validates the L1@L2@L3 folding, banded-concat rewrite, and K-tiled sums."""
    f32 = jnp.float32
    q = lambda a: a.astype(jnp.bfloat16).astype(f32)
    xq, mxq, adjq = q(x), q(mx), q(adj)
    sup_out = q(xq @ q(params["w_out"]))
    sup_in = q(xq @ q(params["w_in"]))
    sup_self = q(xq @ q(params["w_self"]))
    out_feat = jax.nn.relu(mxq @ sup_out + params["b_out"])
    in_feat = jax.nn.relu(mxq.T @ sup_in + params["b_in"])
    self_feat = jax.nn.relu(adjq @ sup_self + params["b_self"])
    h = jnp.concatenate([out_feat, in_feat, self_feat], axis=1)
    h = h @ params["layer1"] + params["bias1"]
    h = h @ params["layer2"] + params["bias2"]
    h = h @ params["layer3"] + params["bias3"]
    return h


if __name__ == "__main__":
    N, nfeat, nout, proportion = 256, 32, 8, 16

    key = jax.random.PRNGKey(0)
    kx, kmx, kadj, kp = jax.random.split(key, 4)

    x = jax.random.normal(kx, (N, nfeat), jnp.float32)
    mx = jax.random.uniform(kmx, (N, N), jnp.float32)
    adj = jax.random.uniform(kadj, (N, N), jnp.float32)
    params = init_params(kp, nfeat, nout, proportion)

    # Graph-static prep done once; reused by every forward call.
    cfg = make_config(N)
    graph = prepare_graph(mx, adj, cfg)

    out = adjtrigcn_apply(x, graph, params, cfg)
    out = jax.block_until_ready(out)

    ref = adjtrigcn_reference(x, mx, adj, params)
    assert out.shape == (N, nout)
    max_err = jnp.max(jnp.abs(out - ref))
    assert jnp.allclose(out, ref, atol=1e-2, rtol=1e-2), f"max abs err {max_err}"

    print("KERNEL_OK")
</pallas_src>

<mosaic_0001>
module attributes {stable_mosaic.version = 11 : i64} {
  func.func @_proj_kernel(%arg0: i32, %arg1: memref<256x32xbf16, #tpu.memory_space<vmem>>, %arg2: memref<32x64xbf16, #tpu.memory_space<vmem>>, %arg3: memref<256x64xbf16, #tpu.memory_space<vmem>>) attributes {dimension_semantics = [#tpu.dimension_semantics<parallel>], iteration_bounds = array<i64: 1>, scalar_prefetch = 0 : i64, scratch_operands = 0 : i64, tpu.core_type = #tpu.core_type<tc>, window_params = [{transform_indices = @transform_0, window_bounds = array<i64: 256, 32>}, {pipeline_mode = #tpu.pipeline_mode<synchronous>, transform_indices = @transform_1, window_bounds = array<i64: 32, 64>}, {transform_indices = @transform_2, window_bounds = array<i64: 256, 64>}]} {
    %c0 = arith.constant 0 : index
    %c0_0 = arith.constant 0 : index
    %0 = vector.load %arg1[%c0, %c0_0] : memref<256x32xbf16, #tpu.memory_space<vmem>>, vector<256x32xbf16>
    %c0_1 = arith.constant 0 : index
    %c0_2 = arith.constant 0 : index
    %1 = vector.load %arg2[%c0_1, %c0_2] : memref<32x64xbf16, #tpu.memory_space<vmem>>, vector<32x64xbf16>
    %cst = arith.constant dense<0.000000e+00> : vector<256x64xf32>
    %2 = tpu.matmul %0, %1, %cst {dimension_numbers = #tpu.dot_dimension_numbers<[1], [0], [0], [1], [0, 0, 1, 1], [], []>} : vector<256x32xbf16>, vector<32x64xbf16>, vector<256x64xf32> -> vector<256x64xf32>
    %3 = arith.truncf %2 : vector<256x64xf32> to vector<256x64xbf16>
    %c0_3 = arith.constant 0 : index
    %c0_4 = arith.constant 0 : index
    %4 = vector.load %arg3[%c0_3, %c0_4] : memref<256x64xbf16, #tpu.memory_space<vmem>>, vector<256x64xbf16>
    tpu.vector_store %arg3[%c0_3, %c0_4], %3 {strides = array<i32>} : memref<256x64xbf16, #tpu.memory_space<vmem>>, vector<256x64xbf16>,
    return
  }
  func.func @transform_0(%arg0: i32) -> (i32, i32) {
    %c0_i32 = arith.constant 0 : i32
    %c0_i32_0 = arith.constant 0 : i32
    return %arg0, %c0_i32 : i32, i32
  }
  func.func @transform_1(%arg0: i32) -> (i32, i32) {
    %c0_i32 = arith.constant 0 : i32
    %c0_i32_0 = arith.constant 0 : i32
    %c0_i32_1 = arith.constant 0 : i32
    return %c0_i32, %c0_i32_0 : i32, i32
  }
  func.func @transform_2(%arg0: i32) -> (i32, i32) {
    %c0_i32 = arith.constant 0 : i32
    %c0_i32_0 = arith.constant 0 : i32
    return %arg0, %c0_i32 : i32, i32
  }
}

</mosaic_0001>

<bundles_post_ra>
// kernel: tpu_custom_call.1
= control target key start
LH: loop header
LB: loop body
LE: loop exit
PB: predicated region body
PF: predicated region fallthrough
CT: control target
= control target key end

     0   :  { %vm140_vm0 = vcmask 261120   ;;  %vm478_vm1 = vcmask 519168   ;;  %s902_s1 = inlined_call_operand.vmem [shape: bf16[32,64], index: 1, kind: input, shape index: {}]   ;;  %s903_s0 = inlined_call_operand.vmem [shape: bf16[256,32], index: 0, kind: input, shape index: {}]   ;;  %s904_s2 = inlined_call_operand.vmem [shape: bf16[256,64], index: 2, kind: output, shape index: {}]  }
   0x1   :  { %v671_v0 = vld [vmem:[%s902_s1 + $0x8] sm:$0xff]   ;;  %v672_v1 = vld [vmem:[%s902_s1] sm:$0xff]   ;;  %v677_v6 = vld [vmem:[%s903_s0 + $0x10] sm:$0xff]  }
   0x2   :  { %631 = vmatprep.subr.bf16.mxu0 %v671_v0  ;;  %667 = vmatprep.subr.bf16.mxu1 %v671_v0  ;;  %v673_v2 = vld [vmem:[%s903_s0] sm:$0xff]   ;;  %v675_v4 = vld [vmem:[%s903_s0 + $0x8] sm:$0xff]   ;;  %v678_v7 = vld [vmem:[%s903_s0 + $0x50] sm:$0xff]  }
   0x3   :  { %632 = vmatpush3.bf16.msra.mxu0 %v671_v0  ;;  %669 = vmatpush3.bf16.msra.mxu1 %v671_v0  ;;  %v674_v3 = vld [vmem:[%s903_s0 + $0x40] sm:$0xff]   ;;  %v676_v5 = vld [vmem:[%s903_s0 + $0x48] sm:$0xff]   ;;  %v679_v8 = vld [vmem:[%s903_s0 + $0x18] sm:$0xff]  }
   0x4   :  { %633 = vmatprep.subr.bf16.mxu0 %v672_v1  ;;  %668 = vmatprep.subr.bf16.mxu1 %v672_v1  ;;  %v680_v9 = vld [vmem:[%s903_s0 + $0x58] sm:$0xff]   ;;  %v681_v10 = vld [vmem:[%s903_s0 + $0x20] sm:$0xff]   ;;  %v683_v12 = vld [vmem:[%s903_s0 + $0x28] sm:$0xff]  }
   0x5   :  { %635 = vmatprep.mubr.msk.bf16.mxu0 %vm140_vm0, %v673_v2  ;;  %651 = vmatprep.mubr.msk.bf16.mxu1 %vm140_vm0, %v674_v3  ;;  %v682_v11 = vld [vmem:[%s903_s0 + $0x60] sm:$0xff]   ;;  %v684_v13 = vld [vmem:[%s903_s0 + $0x68] sm:$0xff]   ;;  %v685_v14 = vld [vmem:[%s903_s0 + $0x30] sm:$0xff]  }
   0x6   :  { %v686_v15 = vld [vmem:[%s903_s0 + $0x70] sm:$0xff]   ;;  %v687_v16 = vld [vmem:[%s903_s0 + $0x38] sm:$0xff]  }
   0x7   :  { %634 = vmatpush3.bf16.msra.mxu0 %v672_v1  ;;  %670 = vmatpush3.bf16.msra.mxu1 %v672_v1  ;;  %v688_v17 = vld [vmem:[%s903_s0 + $0x78] sm:$0xff]  }
   0xa   :  { %636 = vmatmul.mubr.msk.bf16.vlgmr.msra.gmra.mxu0 %vm140_vm0, %v675_v4  ;;  %652 = vmatmul.mubr.msk.bf16.vlgmr.msra.gmra.mxu1 %vm140_vm0, %v676_v5 }
   0xb   :  { %639 = vmatprep.mubr.msk.bf16.mxu0 %vm140_vm0, %v677_v6  ;;  %655 = vmatprep.mubr.msk.bf16.mxu1 %vm140_vm0, %v678_v7 }
  0x12   :  { %640 = vmatmul.mubr.msk.bf16.gmra.mxu0 %vm140_vm0, %v679_v8  ;;  %656 = vmatmul.mubr.msk.bf16.gmra.mxu1 %vm140_vm0, %v680_v9 }
  0x13   :  { %643 = vmatprep.mubr.msk.bf16.mxu0 %vm140_vm0, %v681_v10  ;;  %659 = vmatprep.mubr.msk.bf16.mxu1 %vm140_vm0, %v682_v11 }
  0x1a   :  { %644 = vmatmul.mubr.msk.bf16.gmra.mxu0 %vm140_vm0, %v683_v12  ;;  %660 = vmatmul.mubr.msk.bf16.gmra.mxu1 %vm140_vm0, %v684_v13 }
  0x1b   :  { %647 = vmatprep.mubr.msk.bf16.mxu0 %vm140_vm0, %v685_v14  ;;  %663 = vmatprep.mubr.msk.bf16.mxu1 %vm140_vm0, %v686_v15 }
  0x22   :  { %648 = vmatmul.mubr.msk.bf16.gmra.mxu0 %vm140_vm0, %v687_v16  ;;  %664 = vmatmul.mubr.msk.bf16.gmra.mxu1 %vm140_vm0, %v688_v17 }
  0xca   :  { %v637_v18 = vpop.f32.mrf.mxu0  ;;  %v653_v19 = vpop.f32.mrf.mxu1 }
  0xcb   :  { %v583_v20 = vpack.c.bf16 %v637_v18, %v637_v18  ;;  %v599_v21 = vpack.c.bf16 %v653_v19, %v653_v19 }
  0xcc   :  { %v223_v22 = vpop.f32.mrf.mxu0  ;;  %v287_v23 = vpop.f32.mrf.mxu1 }
  0xcd   :  { %481 = vst.msk [vmem:[%s904_s2 + $0x8] sm:$0xf] %vm478_vm1, %v583_v20  ;;  %497 = vst.msk [vmem:[%s904_s2 + $0x48] sm:$0xf] %vm478_vm1, %v599_v21  ;;  %v581_v24 = vpack.c.bf16 %v223_v22, %v223_v22  ;;  %v597_v25 = vpack.c.bf16 %v287_v23, %v287_v23 }
  0xce   :  { %v638_v26 = vpop.f32.mrf.mxu0  ;;  %v654_v27 = vpop.f32.mrf.mxu1 }
  0xcf   :  { %479 = vst.msk [vmem:[%s904_s2] sm:$0xf] %vm478_vm1, %v581_v24  ;;  %495 = vst.msk [vmem:[%s904_s2 + $0x40] sm:$0xf] %vm478_vm1, %v597_v25  ;;  %v584_v28 = vpack.c.bf16 %v638_v26, %v638_v26  ;;  %v600_v29 = vpack.c.bf16 %v654_v27, %v654_v27 }
  0xd0   :  { %v226_v30 = vpop.f32.mrf.mxu0  ;;  %v290_v31 = vpop.f32.mrf.mxu1 }
  0xd1   :  { %482 = vst.msk [vmem:[%s904_s2 + $0xc] sm:$0xf] %vm478_vm1, %v584_v28  ;;  %498 = vst.msk [vmem:[%s904_s2 + $0x4c] sm:$0xf] %vm478_vm1, %v600_v29  ;;  %v582_v32 = vpack.c.bf16 %v226_v30, %v226_v30  ;;  %v598_v33 = vpack.c.bf16 %v290_v31, %v290_v31 }
  0xd2   :  { %v641_v34 = vpop.f32.mrf.mxu0  ;;  %v657_v35 = vpop.f32.mrf.mxu1 }
  0xd3   :  { %480 = vst.msk [vmem:[%s904_s2 + $0x4] sm:$0xf] %vm478_vm1, %v582_v32  ;;  %496 = vst.msk [vmem:[%s904_s2 + $0x44] sm:$0xf] %vm478_vm1, %v598_v33  ;;  %v587_v36 = vpack.c.bf16 %v641_v34, %v641_v34  ;;  %v603_v37 = vpack.c.bf16 %v657_v35, %v657_v35 }
  0xd4   :  { %v239_v38 = vpop.f32.mrf.mxu0  ;;  %v303_v39 = vpop.f32.mrf.mxu1 }
  0xd5   :  { %485 = vst.msk [vmem:[%s904_s2 + $0x18] sm:$0xf] %vm478_vm1, %v587_v36  ;;  %501 = vst.msk [vmem:[%s904_s2 + $0x58] sm:$0xf] %vm478_vm1, %v603_v37  ;;  %v585_v40 = vpack.c.bf16 %v239_v38, %v239_v38  ;;  %v601_v41 = vpack.c.bf16 %v303_v39, %v303_v39 }
  0xd6   :  { %v642_v42 = vpop.f32.mrf.mxu0  ;;  %v658_v43 = vpop.f32.mrf.mxu1 }
  0xd7   :  { %483 = vst.msk [vmem:[%s904_s2 + $0x10] sm:$0xf] %vm478_vm1, %v585_v40  ;;  %499 = vst.msk [vmem:[%s904_s2 + $0x50] sm:$0xf] %vm478_vm1, %v601_v41  ;;  %v588_v44 = vpack.c.bf16 %v642_v42, %v642_v42  ;;  %v604_v45 = vpack.c.bf16 %v658_v43, %v658_v43 }
  0xd8   :  { %v242_v46 = vpop.f32.mrf.mxu0  ;;  %v306_v47 = vpop.f32.mrf.mxu1 }
  0xd9   :  { %486 = vst.msk [vmem:[%s904_s2 + $0x1c] sm:$0xf] %vm478_vm1, %v588_v44  ;;  %502 = vst.msk [vmem:[%s904_s2 + $0x5c] sm:$0xf] %vm478_vm1, %v604_v45  ;;  %v586_v48 = vpack.c.bf16 %v242_v46, %v242_v46  ;;  %v602_v49 = vpack.c.bf16 %v306_v47, %v306_v47 }
  0xda   :  { %v645_v50 = vpop.f32.mrf.mxu0  ;;  %v661_v51 = vpop.f32.mrf.mxu1 }
  0xdb   :  { %484 = vst.msk [vmem:[%s904_s2 + $0x14] sm:$0xf] %vm478_vm1, %v586_v48  ;;  %500 = vst.msk [vmem:[%s904_s2 + $0x54] sm:$0xf] %vm478_vm1, %v602_v49  ;;  %v591_v52 = vpack.c.bf16 %v645_v50, %v645_v50  ;;  %v607_v53 = vpack.c.bf16 %v661_v51, %v661_v51 }
  0xdc   :  { %v255_v54 = vpop.f32.mrf.mxu0  ;;  %v319_v55 = vpop.f32.mrf.mxu1 }
  0xdd   :  { %489 = vst.msk [vmem:[%s904_s2 + $0x28] sm:$0xf] %vm478_vm1, %v591_v52  ;;  %505 = vst.msk [vmem:[%s904_s2 + $0x68] sm:$0xf] %vm478_vm1, %v607_v53  ;;  %v589_v56 = vpack.c.bf16 %v255_v54, %v255_v54  ;;  %v605_v57 = vpack.c.bf16 %v319_v55, %v319_v55 }
  0xde   :  { %v646_v58 = vpop.f32.mrf.mxu0  ;;  %v662_v59 = vpop.f32.mrf.mxu1 }
  0xdf   :  { %487 = vst.msk [vmem:[%s904_s2 + $0x20] sm:$0xf] %vm478_vm1, %v589_v56  ;;  %503 = vst.msk [vmem:[%s904_s2 + $0x60] sm:$0xf] %vm478_vm1, %v605_v57  ;;  %v592_v60 = vpack.c.bf16 %v646_v58, %v646_v58  ;;  %v608_v61 = vpack.c.bf16 %v662_v59, %v662_v59 }
  0xe0   :  { %v258_v62 = vpop.f32.mrf.mxu0  ;;  %v322_v63 = vpop.f32.mrf.mxu1 }
  0xe1   :  { %490 = vst.msk [vmem:[%s904_s2 + $0x2c] sm:$0xf] %vm478_vm1, %v592_v60  ;;  %506 = vst.msk [vmem:[%s904_s2 + $0x6c] sm:$0xf] %vm478_vm1, %v608_v61  ;;  %v590_v0 = vpack.c.bf16 %v258_v62, %v258_v62  ;;  %v606_v1 = vpack.c.bf16 %v322_v63, %v322_v63 }
  0xe2   :  { %v649_v2 = vpop.f32.mrf.mxu0  ;;  %v665_v3 = vpop.f32.mrf.mxu1 }
  0xe3   :  { %488 = vst.msk [vmem:[%s904_s2 + $0x24] sm:$0xf] %vm478_vm1, %v590_v0  ;;  %504 = vst.msk [vmem:[%s904_s2 + $0x64] sm:$0xf] %vm478_vm1, %v606_v1  ;;  %v595_v4 = vpack.c.bf16 %v649_v2, %v649_v2  ;;  %v611_v5 = vpack.c.bf16 %v665_v3, %v665_v3 }
  0xe4   :  { %v271_v6 = vpop.f32.mrf.mxu0  ;;  %v335_v7 = vpop.f32.mrf.mxu1 }
  0xe5   :  { %493 = vst.msk [vmem:[%s904_s2 + $0x38] sm:$0xf] %vm478_vm1, %v595_v4  ;;  %509 = vst.msk [vmem:[%s904_s2 + $0x78] sm:$0xf] %vm478_vm1, %v611_v5  ;;  %v593_v8 = vpack.c.bf16 %v271_v6, %v271_v6  ;;  %v609_v9 = vpack.c.bf16 %v335_v7, %v335_v7 }
  0xe6   :  { %v650_v10 = vpop.f32.mrf.mxu0  ;;  %v666_v11 = vpop.f32.mrf.mxu1 }
  0xe7   :  { %491 = vst.msk [vmem:[%s904_s2 + $0x30] sm:$0xf] %vm478_vm1, %v593_v8  ;;  %507 = vst.msk [vmem:[%s904_s2 + $0x70] sm:$0xf] %vm478_vm1, %v609_v9  ;;  %v596_v12 = vpack.c.bf16 %v650_v10, %v650_v10  ;;  %v612_v13 = vpack.c.bf16 %v666_v11, %v666_v11 }
  0xe8   :  { %v274_v14 = vpop.f32.mrf.mxu0  ;;  %v338_v15 = vpop.f32.mrf.mxu1 }
  0xe9   :  { %494 = vst.msk [vmem:[%s904_s2 + $0x3c] sm:$0xf] %vm478_vm1, %v596_v12  ;;  %510 = vst.msk [vmem:[%s904_s2 + $0x7c] sm:$0xf] %vm478_vm1, %v612_v13  ;;  %v594_v16 = vpack.c.bf16 %v274_v14, %v274_v14  ;;  %v610_v17 = vpack.c.bf16 %v338_v15, %v338_v15 }
  0xeb   :  { %492 = vst.msk [vmem:[%s904_s2 + $0x34] sm:$0xf] %vm478_vm1, %v594_v16  ;;  %508 = vst.msk [vmem:[%s904_s2 + $0x74] sm:$0xf] %vm478_vm1, %v610_v17 }

</bundles_post_ra>
